<compile_context>
chip_gen: v7x
topology: tpu7x:2x2x1
jax: 0.10.0
libtpu: 0.0.40
codegen_flags: <defaults>
</compile_context>

<pallas_src>
import math

import jax
import jax.numpy as jnp
from jax.experimental import pallas as pl
from jax.experimental.pallas import tpu as pltpu


def _bcast_dropout_kernel(mult_ref, x_ref, o_ref):
    # mult_ref: (1, D) f32 multiplier (0.0 or 1/keep_prob), broadcast over seq.
    # x_ref / o_ref: (TS, D) tiles in x.dtype.
    o_ref[...] = (x_ref[...].astype(jnp.float32) * mult_ref[...]).astype(o_ref.dtype)


def _lane_fold_factor(S, D):
    """Fold k consecutive seq rows into the last dim so it is a multiple of 128
    (lane-dense loads/stores).  Valid because the mask is constant along seq."""
    if D % 128 == 0:
        return 1
    k = 128 // math.gcd(D, 128)
    if k > 1 and S % k == 0:
        return k
    return 1  # fall back to masked partial stores


def _pick_tiles(S, D, itemsize):
    """Pick the seq-tile size and an explicit VMEM limit, per generation."""
    try:
        vmem_cap = int(pltpu.get_tpu_info().vmem_capacity_bytes)
    except Exception:
        vmem_cap = 64 * 1024 * 1024  # v7x per-TC physical VMEM (most constrained)

    # in + out are each double-buffered -> ~4 tile-sized buffers live at once.
    per_buf_target = min(8 * 1024 * 1024, vmem_cap // 8)
    rows_mult = 8 * max(1, 4 // max(1, itemsize))  # f32 -> 8, bf16 -> 16, int8 -> 32

    ts = per_buf_target // max(1, D * itemsize)
    if ts >= S:
        ts = S
    else:
        ts = max(rows_mult, (ts // rows_mult) * rows_mult)
        ts = min(ts, S)

    tile_bytes = ts * D * itemsize
    need = 4 * tile_bytes + 2 * D * 4 + (2 << 20)  # tiles + mask + slack
    vmem_limit = int(min(max(need, 32 * 1024 * 1024), (vmem_cap * 3) // 4))
    return ts, vmem_limit


def broadcasted_dropout(x, seed, rate=0.0, mode="train", broadcast_dims=(-2,),
                        seq_tile=None, donate_x=False):
    """Forward pass of BroadcastedDropout."""
    if rate >= 1.0:
        raise ValueError(f"Dropout rate ({rate}) must be < 1")
    if rate < 0:
        raise ValueError(f"Dropout rate ({rate}) must be >= 0.0")

    if mode != "train" or rate == 0.0:
        return x

    # TODO(synk): only broadcast_dims=(-2,) (the module default) is implemented
    # in the kernel; other broadcast patterns would need a different mask layout.
    assert tuple(broadcast_dims) == (-2,), "kernel implements the default broadcast_dims=(-2,)"

    B, S, D = x.shape
    keep_prob = 1.0 - rate

    # One (B, 1, D) Bernoulli mask per call (distributionally matches the
    # module's np.random.binomial; draws differ since this uses jax.random).
    key = jax.random.PRNGKey(seed)
    keep = jax.random.bernoulli(key, p=keep_prob, shape=(B, 1, D))
    mult = keep.astype(jnp.float32) * jnp.float32(1.0 / keep_prob)  # 0 or 1/keep_prob, f32

    # Lane-density fold: keep the last dim a multiple of 128 when possible.
    k = _lane_fold_factor(S, D)
    S_eff, D_eff = S // k, k * D
    x_eff = x.reshape(B, S_eff, D_eff) if k > 1 else x
    mult_eff = jnp.tile(mult, (1, 1, k)) if k > 1 else mult

    itemsize = jnp.dtype(x.dtype).itemsize
    ts, vmem_limit = _pick_tiles(S_eff, D_eff, itemsize)
    if seq_tile is not None:  # explicit override (e.g. to exercise partial tiles)
        ts = min(int(seq_tile), S_eff)

    out = pl.pallas_call(
        _bcast_dropout_kernel,
        out_shape=jax.ShapeDtypeStruct((B, S_eff, D_eff), x.dtype),
        grid_spec=pltpu.PrefetchScalarGridSpec(
            num_scalar_prefetch=0,
            grid=(B, pl.cdiv(S_eff, ts)),
            in_specs=[
                # mask: same (1, D_eff) block for every seq tile of batch b
                pl.BlockSpec((pl.Squeezed(), 1, D_eff), lambda b, s: (b, 0, 0)),
                # x: one (TS, D_eff) seq tile per grid step
                pl.BlockSpec((pl.Squeezed(), ts, D_eff), lambda b, s: (b, s, 0)),
            ],
            out_specs=pl.BlockSpec((pl.Squeezed(), ts, D_eff), lambda b, s: (b, s, 0)),
        ),
        compiler_params=pltpu.CompilerParams(
            dimension_semantics=("parallel", "parallel"),
            vmem_limit_bytes=vmem_limit,
        ),
        input_output_aliases=({1: 0} if donate_x else {}),
    )(mult_eff, x_eff)

    return out.reshape(B, S, D) if k > 1 else out


if __name__ == "__main__":
    key = jax.random.PRNGKey(0)
    B, S, D = 2, 8, 128
    x = jax.random.normal(key, (B, S, D), dtype=jnp.float32)

    rate = 0.1
    keep_prob = 1.0 - rate

    out = broadcasted_dropout(x, seed=1234, rate=rate, mode="train", broadcast_dims=(-2,))
    out = jax.block_until_ready(out)

    # Every element is either dropped (0) or scaled by 1/keep_prob.
    ratio = jnp.where(jnp.abs(x) > 1e-6, out / x, 1.0 / keep_prob)
    ok_vals = jnp.all(
        jnp.isclose(ratio, 0.0, atol=1e-5) | jnp.isclose(ratio, 1.0 / keep_prob, atol=1e-4)
    )
    # Mask is broadcast across the seq (-2) axis.
    ok_bcast = jnp.all(jnp.isclose(ratio, ratio[:, :1, :], atol=1e-4))
    # Eval mode -> identity.
    out_eval = broadcasted_dropout(x, seed=1234, rate=rate, mode="eval")
    ok_eval = jnp.all(out_eval == x)

    # Partial final seq tile (S not divisible by the seq tile) exercises the
    # masked block-writeback path flagged in the review.
    x2 = jax.random.normal(jax.random.PRNGKey(1), (1, 20, 128), dtype=jnp.float32)
    out2 = jax.block_until_ready(
        broadcasted_dropout(x2, seed=7, rate=rate, seq_tile=8)
    )
    r2 = jnp.where(jnp.abs(x2) > 1e-6, out2 / x2, 1.0 / keep_prob)
    ok_partial = jnp.all(
        jnp.isclose(r2, 0.0, atol=1e-5) | jnp.isclose(r2, 1.0 / keep_prob, atol=1e-4)
    ) & jnp.all(jnp.isclose(r2, r2[:, :1, :], atol=1e-4))

    assert bool(ok_vals) and bool(ok_bcast) and bool(ok_eval) and bool(ok_partial)
    print("KERNEL_OK")
</pallas_src>

<mosaic_0001>
module attributes {stable_mosaic.version = 11 : i64} {
  func.func @_bcast_dropout_kernel(%arg0: i32, %arg1: i32, %arg2: memref<1x1x128xf32, #tpu.memory_space<vmem>>, %arg3: memref<1x8x128xf32, #tpu.memory_space<vmem>>, %arg4: memref<1x8x128xf32, #tpu.memory_space<vmem>>) attributes {dimension_semantics = [#tpu.dimension_semantics<parallel>, #tpu.dimension_semantics<parallel>], iteration_bounds = array<i64: 2, 1>, scalar_prefetch = 0 : i64, scratch_operands = 0 : i64, tpu.core_type = #tpu.core_type<tc>, window_params = [{transform_indices = @transform_0, window_bounds = array<i64: 1, 1, 128>}, {transform_indices = @transform_1, window_bounds = array<i64: 1, 8, 128>}, {transform_indices = @transform_2, window_bounds = array<i64: 1, 8, 128>}]} {
    %c0 = arith.constant 0 : index
    %c0_0 = arith.constant 0 : index
    %c0_1 = arith.constant 0 : index
    %0 = vector.load %arg3[%c0, %c0_0, %c0_1] : memref<1x8x128xf32, #tpu.memory_space<vmem>>, vector<1x8x128xf32>
    %1 = vector.shape_cast %0 : vector<1x8x128xf32> to vector<8x128xf32>
    %c0_2 = arith.constant 0 : index
    %c0_3 = arith.constant 0 : index
    %c0_4 = arith.constant 0 : index
    %2 = vector.load %arg2[%c0_2, %c0_3, %c0_4] : memref<1x1x128xf32, #tpu.memory_space<vmem>>, vector<1x1x128xf32>
    %3 = vector.shape_cast %2 : vector<1x1x128xf32> to vector<1x128xf32>
    %4 = vector.broadcast %3 : vector<1x128xf32> to vector<8x128xf32>
    %5 = arith.mulf %1, %4 : vector<8x128xf32>
    %c0_5 = arith.constant 0 : index
    %c0_6 = arith.constant 0 : index
    %c0_7 = arith.constant 0 : index
    %6 = vector.load %arg4[%c0_5, %c0_6, %c0_7] : memref<1x8x128xf32, #tpu.memory_space<vmem>>, vector<1x8x128xf32>
    %7 = vector.shape_cast %6 : vector<1x8x128xf32> to vector<8x128xf32>
    %8 = vector.shape_cast %5 : vector<8x128xf32> to vector<1x8x128xf32>
    tpu.vector_store %arg4[%c0_5, %c0_6, %c0_7], %8 {strides = array<i32>} : memref<1x8x128xf32, #tpu.memory_space<vmem>>, vector<1x8x128xf32>,
    return
  }
  func.func @transform_0(%arg0: i32, %arg1: i32) -> (i32, i32, i32) {
    %c0_i32 = arith.constant 0 : i32
    %c0_i32_0 = arith.constant 0 : i32
    %c0_i32_1 = arith.constant 0 : i32
    return %arg0, %c0_i32, %c0_i32_0 : i32, i32, i32
  }
  func.func @transform_1(%arg0: i32, %arg1: i32) -> (i32, i32, i32) {
    %c0_i32 = arith.constant 0 : i32
    %c0_i32_0 = arith.constant 0 : i32
    return %arg0, %arg1, %c0_i32 : i32, i32, i32
  }
  func.func @transform_2(%arg0: i32, %arg1: i32) -> (i32, i32, i32) {
    %c0_i32 = arith.constant 0 : i32
    %c0_i32_0 = arith.constant 0 : i32
    return %arg0, %arg1, %c0_i32 : i32, i32, i32
  }
}

</mosaic_0001>

<bundles_post_ra>
// kernel: tpu_custom_call.1
= control target key start
LH: loop header
LB: loop body
LE: loop exit
PB: predicated region body
PF: predicated region fallthrough
CT: control target
= control target key end

     0   :  { %7 = vsyncpa [#allocation3], 0  ;;  %s800_s0 = inlined_call_operand.hbm [shape: f32[2,1,128], index: 0, kind: input, shape index: {}]   ;;  %s801_s1 = inlined_call_operand.hbm [shape: f32[2,8,128], index: 1, kind: input, shape index: {}]   ;;  %s802_s2 = inlined_call_operand.hbm [shape: f32[2,8,128], index: 2, kind: output, shape index: {}]  }
   0x1   :  { %9 = vsyncpa [#allocation3 + $0x1], 0 }
   0x2   :  { %10 = vsyncpa [#allocation6], 0 }
   0x3   :  { %12 = vsyncpa [#allocation6 + $0x1], 0 }
   0x4   :  { %13 = vsyncpa [#allocation4], 0 }
   0x5   :  { %15 = vsyncpa [#allocation4 + $0x1], 0  ;;  %s583_s9 = smov 0   ;;  %s585_s10 = smov 0  }
   0x6   :  { %s587_s11 = smov 0   ;;  %s589_s12 = smov 0  }
   0x7   :  { %s591_s13 = smov 0   ;;  %s593_s14 = smov 0  }
   0x8 LB: > { %s335_s15 = sadd.s32 4294967295, %s563_s14   ;;  %s336_s16 = sadd.s32 4294967294, %s563_s14   ;;  %s563_s14 = sphi %s593_s14, %s21_s14   ;;  %s559_s13 = sphi %s591_s13, %s822_s13   ;;  %s555_s12 = sphi %s589_s12, %s821_s12   ;;  %s551_s11 = sphi %s587_s11, %s820_s11   ;;  %s547_s10 = sphi %s585_s10, %s819_s10   ;;  %s543_s9 = sphi %s583_s9, %s818_s9  }
   0x9   : > { %s33_s17 = sadd.s32 1, %s559_s13  ;;  %s40_s18 = sadd.s32 1, %s551_s11 }
   0xa   : > { %p35_p0 = scmp.ge.s32.totalorder %s33_s17, 2  ;;  %p47_p1 = scmp.ne.s32.totalorder %s551_s11, %s547_s10 }
   0xb   : > { %p48_p2 = scmp.eq.s32.totalorder %s563_s14, 0  ;;  %p53_p3 = scmp.ne.s32.totalorder %s547_s10, %s543_s9 }
   0xc   : > { %s824_s17 = smov (%p35_p0, %s33_s17), 0  ;;  %p54_p5 = scmp.eq.s32.totalorder %s335_s15, 0 }
   0xd   : > { %p624_p4 = por %p48_p2, %p47_p1  ;;  %s37_s20 = ssub.s32 %s559_s13, %s824_s17 }
   0xe   : > { %p107_p6 = scmp.eq.s32.totalorder %s335_s15, 1  ;;  %p38_p7 = scmp.eq.s32.totalorder %s37_s20, 0 }
   0xf   : > { %p630_p8 = por %p54_p5, %p53_p3  ;;  %p113_p10 = scmp.eq.s32.totalorder %s336_s16, 1 }
  0x10   : > { %p634_p9 = por %p107_p6, %p47_p1  ;;  %p367_p13 = scmp.lt.s32.totalorder %s563_s14, 2 }
  0x11   : > { %s806_s21 = scalar_select %p630_p8, 1, 0 }
  0x12   : > { %s807_s22 = scalar_select %p634_p9, 1, 0 }
  0x13   : > { %s639_s23 = scalar_select %p38_p7, %s551_s11, %s40_s18  }
  0x14   : > { %p641_p11 = por %p113_p10, %p53_p3  ;;  %s648_s25 = sand.u32 1, %s551_s11  }
  0x15   : > { %s339_s26 = sshll.u32 %s559_s13, 4  ;;  %s136_s27 = scalar_lea.vmem [#allocation2], %s648_s25 }
  0x16   : > { %s808_s24 = scalar_select %p641_p11, 1, 0 }
  0x17   : > { %s143_s28 = sshll.u32 %s136_s27, 4  ;;  %s655_s3 = scalar_lea.hbm %s800_s0, %s339_s26  ;;  %s657_s28 = int_to_ptr.vmem [resolvable:$true] %s143_s28 }
  0x18   : > { %p661_p0 = pnand %p367_p13, %p624_p4  ;;  %s340_s5 = sshll.u32 %s648_s25, 3 }
  0x19   : > { %s134_s6 = scalar_lea.sflag [#allocation3], %s648_s25  ;;  %s417_s7 = scalar_lea.hbm %s655_s3, 16 }
  0x1a   : > { %p418_p3 = scmp.ne.s32.totalorder %s655_s3, %s417_s7  ;;  %p419_p5 = pneg %p661_p0 }
  0x1b   : > { %s422_s16 = scalar_lea.hbm %s800_s0, 32  ;;  %p423_p4 = scmp.lt.u32.totalorder %s655_s3, %s800_s0 }
  0x1c   : > { %p420_p6 = pnand %p419_p5, %p418_p3  ;;  %p424_p10 = scmp.lt.u32.totalorder %s422_s16, %s417_s7 }
  0x1d   : > { %p426_p12 = scmp.lt.u32.totalorder %s417_s7, %s655_s3 }
  0x1e   : > { %p421_p7 = pneg %p420_p6  ;;  %p425_p13 = por %p424_p10, %p423_p4 }
  0x20   : > { %p427_p1 = por %p426_p12, %p425_p13 }
  0x22   : > { %p428_p2 = pnand %p427_p1, %p421_p7 }
  0x24   : > { %431 = shalt.err (!%p428_p2)
}
  0x25   : > { %s432_s20 = scalar_lea.vmem %s657_s28, 16  ;;  %s565_s26 = smov [#allocation2]  }
  0x26   : > { %p433_p3 = scmp.ne.s32.totalorder %s657_s28, %s432_s20  ;;  %s437_s27 = sshll.u32 %s565_s26, 4  ;;  %s438_s27 = int_to_ptr.vmem [resolvable:$false] %s437_s27 }
  0x27   : > { %s439_s29 = scalar_lea.vmem %s438_s27, 32  ;;  %p440_p9 = scmp.lt.s32.totalorder %s657_s28, %s438_s27 }
  0x28   : > { %p435_p6 = pnand %p433_p3, %p419_p5  ;;  %p441_p4 = scmp.lt.s32.totalorder %s439_s29, %s432_s20 }
  0x2a   : > { %p436_p11 = pneg %p435_p6  ;;  %p442_p10 = por %p441_p4, %p440_p9 }
  0x2c   : > { %p443_p12 = pnand %p442_p10, %p436_p11 }
  0x2e   : > { %446 = shalt.err (!%p443_p12)
}
  0x2f   : > { %359 = dma.hbm_to_vmem [thread:$0]  (!%p661_p0), %s655_s3, 16, %s657_s28, %s134_s6  }
  0x30   : > { %p810_p1 = scmp.lt.s32.totalorder %s563_s14, 3  ;;  %p811_p2 = scmp.ge.s32.totalorder %s563_s14, 1 }
  0x31   : > { %s341_s7 = sshll.u32 %s559_s13, 7  ;;  %s154_s8 = scalar_lea.vmem [#allocation5], %s340_s5 }
  0x32   : > { %p698_p7 = pnand %p811_p2, %p810_p1  ;;  %s162_s15 = sshll.u32 %s154_s8, 4  ;;  %s163_s15 = int_to_ptr.vmem [resolvable:$true] %s162_s15 }
  0x33   : > { %s708_s19 = scalar_lea.hbm %s801_s1, %s341_s7  ;;  %s151_s28 = scalar_lea.sflag [#allocation6], %s648_s25 }
  0x34   : > { %s812_s30 = scalar_select %p698_p7, 1, 0 }
  0x35   : > { %s447_s3 = scalar_lea.hbm %s708_s19, 128  ;;  %s452_s20 = scalar_lea.hbm %s801_s1, 256 }
  0x36   : > { %p448_p9 = scmp.ne.s32.totalorder %s708_s19, %s447_s3  ;;  %p453_p3 = scmp.lt.u32.totalorder %s708_s19, %s801_s1 }
  0x37   : > { %p454_p6 = scmp.lt.u32.totalorder %s452_s20, %s447_s3  ;;  %p456_p10 = scmp.lt.u32.totalorder %s447_s3, %s708_s19 }
  0x38   : > { %p450_p11 = pnand %p448_p9, %p419_p5 }
  0x39   : > { %p455_p4 = por %p454_p6, %p453_p3 }
  0x3a   : > { %p451_p13 = pneg %p450_p11 }
  0x3b   : > { %p457_p12 = por %p456_p10, %p455_p4 }
  0x3d   : > { %p458_p1 = pnand %p457_p12, %p451_p13 }
  0x3f   : > { %461 = shalt.err (!%p458_p1)
}
  0x40   : > { %s462_s25 = scalar_lea.vmem %s163_s15, 128  ;;  %s566_s29 = smov [#allocation5]  }
  0x41   : > { %p463_p2 = scmp.ne.s32.totalorder %s163_s15, %s462_s25  ;;  %s467_s7 = sshll.u32 %s566_s29, 4  ;;  %s468_s7 = int_to_ptr.vmem [resolvable:$false] %s467_s7 }
  0x42   : > { %s469_s8 = scalar_lea.vmem %s468_s7, 256  ;;  %p470_p8 = scmp.lt.s32.totalorder %s163_s15, %s468_s7 }
  0x43   : > { %p465_p9 = pnand %p463_p2, %p419_p5  ;;  %p471_p7 = scmp.lt.s32.totalorder %s469_s8, %s462_s25 }
  0x45   : > { %p466_p11 = pneg %p465_p9  ;;  %p472_p3 = por %p471_p7, %p470_p8 }
  0x47   : > { %p473_p6 = pnand %p472_p3, %p466_p11 }
  0x49   : > { %476 = shalt.err (!%p473_p6)
}
  0x4a   : > { %362 = dma.hbm_to_vmem [thread:$0]  (!%p661_p0), %s708_s19, 128, %s163_s15, %s151_s28  }
  0x4b   : > { %p813_p13 = scmp.ne.s32.totalorder %s812_s30, 0 }
  0x4c   : > { %s733_s16 = sand.u32 (!%p813_p13), 1, %s547_s10   ;;  %p814_p5 = scmp.ne.s32.totalorder (!%p813_p13), %s806_s21, 0 }
  0x4d   : > { %171 = sbr.rel (%p813_p13) target bundleno = 114 (0x72), region = 28  ;;  %s174_s18 = scalar_lea.sflag (!%p813_p13), [#allocation3], %s733_s16 }
  0x4e   : > { %s176_s3 = scalar_lea.vmem (!%p813_p13), [#allocation2], %s733_s16 }
  0x54   : > { %530 = dma.done.wait (%p814_p5), %s174_s18, 16  }
  0x55   : > { %532 = vsyncadd (%p814_p5), %s174_s18, 4294967280  ;;  %s343_s4 = sshll.u32 %s733_s16, 3  ;;  %s182_s15 = scalar_lea.sflag [#allocation6], %s733_s16 }
  0x56   : > { %s185_s30 = scalar_lea.vmem [#allocation5], %s343_s4 }
  0x57   : > { %534 = dma.done.wait (%p814_p5), %s182_s15, 128  }
  0x58   : > { %536 = vsyncadd (%p814_p5), %s182_s15, 4294967168  ;;  %s209_s19 = scalar_lea.vmem [#allocation7], %s343_s4  ;;  %s347_s6 = sshll.u32 %s555_s12, 7  ;;  %v210_v0 = vld [vmem:[%s185_s30] sm:$0xff]  ;;  %v345_v1 = vld [vmem:[%s176_s3] ss:$0 sm:$0xff] }
  0x59   : > { %s235_s28 = sshll.u32 %s209_s19, 4  ;;  %v218_v2 = vmul.f32 %v345_v1, %v210_v0  ;;  %s753_s26 = scalar_lea.hbm %s802_s2, %s347_s6  ;;  %s748_s28 = int_to_ptr.vmem [resolvable:$true] %s235_s28 }
  0x5a   : > { %s221_s21 = scalar_lea.sflag [#allocation4], %s733_s16  ;;  %s477_s27 = scalar_lea.vmem %s748_s28, 128 }
  0x5b   : > { %219 = vst [vmem:[%s209_s19] sm:$0xff] %v218_v2  ;;  %p478_p8 = scmp.ne.s32.totalorder %s748_s28, %s477_s27  ;;  %p815_p0 = scmp.ne.s32.totalorder %s807_s22, 0 }
  0x5c   : > { %s567_s12 = smov [#allocation7]  }
  0x5d   : > { %p479_p7 = pnand %p478_p8, %p815_p0  ;;  %s481_s25 = sshll.u32 %s567_s12, 4  ;;  %s482_s25 = int_to_ptr.vmem [resolvable:$false] %s481_s25 }
  0x5e   : > { %s483_s29 = scalar_lea.vmem %s482_s25, 256  ;;  %p484_p10 = scmp.lt.s32.totalorder %s748_s28, %s482_s25 }
  0x5f   : > { %p480_p4 = pneg %p479_p7  ;;  %p485_p12 = scmp.lt.s32.totalorder %s483_s29, %s477_s27 }
  0x61   : > { %p486_p1 = por %p485_p12, %p484_p10 }
  0x63   : > { %p487_p2 = pnand %p486_p1, %p480_p4 }
  0x65   : > { %490 = shalt.err (!%p487_p2)
}
  0x66   : > { %s491_s7 = scalar_lea.hbm %s753_s26, 128  ;;  %s495_s18 = scalar_lea.hbm %s802_s2, 256 }
  0x67   : > { %p492_p9 = scmp.ne.s32.totalorder %s753_s26, %s491_s7  ;;  %p496_p6 = scmp.lt.u32.totalorder %s753_s26, %s802_s2 }
  0x68   : > { %p497_p13 = scmp.lt.u32.totalorder %s495_s18, %s491_s7  ;;  %p499_p8 = scmp.lt.u32.totalorder %s491_s7, %s753_s26 }
  0x69   : > { %p493_p11 = pnand %p492_p9, %p815_p0 }
  0x6a   : > { %p498_p5 = por %p497_p13, %p496_p6 }
  0x6b   : > { %p494_p3 = pneg %p493_p11 }
  0x6c   : > { %p500_p7 = por %p499_p8, %p498_p5 }
  0x6e   : > { %p501_p4 = pnand %p500_p7, %p494_p3 }
  0x70   : > { %504 = shalt.err (!%p501_p4)
}
  0x71   : > { %354 = dma.vmem_to_hbm [thread:$0]  (%p815_p0), %s748_s28, 128, %s753_s26, %s221_s21  }
  0x72 PF: > { %s247_s15 = sand.u32 1, %s543_s9   ;;  %p816_p10 = scmp.ne.s32.totalorder %s808_s24, 0 }
  0x73   : > { %p817_p12 = scmp.ge.s32.totalorder %s563_s14, 2  ;;  %s248_s30 = scalar_lea.sflag [#allocation4], %s247_s15 }
  0x75   : > { %p364_p1 = pnand %p817_p12, %p816_p10 }
  0x77   : > { %538 = dma.done.wait (!%p364_p1), %s248_s30, 128  }
  0x78   : > { %540 = vsyncadd (!%p364_p1), %s248_s30, 4294967168  ;;  %s21_s14 = sadd.s32 1, %s563_s14   ;;  %s818_s9 = smov %s547_s10 }
  0x79   : > { %p18_p2 = scmp.ge.s32.totalorder %s21_s14, 4   ;;  %s819_s10 = smov %s551_s11 }
  0x7a   : > { %s820_s11 = smov %s639_s23  ;;  %s821_s12 = smov %s559_s13 }
  0x7b   : > { %s822_s13 = smov %s824_s17  ;;  %20 = sbr.rel (!%p18_p2) target bundleno = 8 (0x8), region = 86 }
  0x82   :  { %253 = vsyncpa [#allocation3], 1 }
  0x83   :  { %255 = vsyncpa [#allocation3 + $0x1], 1 }
  0x84   :  { %256 = vsyncpa [#allocation6], 1 }
  0x85   :  { %258 = vsyncpa [#allocation6 + $0x1], 1 }
  0x86   :  { %259 = vsyncpa [#allocation4], 1 }
  0x87   :  { %261 = vsyncpa [#allocation4 + $0x1], 1 }

</bundles_post_ra>
